<compile_context>
chip_gen: v5e
topology: v5e:2x2
jax: 0.10.0
libtpu: 0.0.40
codegen_flags: <defaults>
</compile_context>

<pallas_src>
import functools

import jax
import jax.numpy as jnp
from jax.experimental import pallas as pl
from jax.experimental.pallas import tpu as pltpu

_LANES = 128


def _ce_label_smooth_kernel(logits_ref, labels_ref, partial_ref, *,
                            epsilon, num_classes, n_rows, block_rows):
    x = logits_ref[...]                                   # (TN, C) native dtype
    labels = labels_ref[...]                              # (TN, 1) int32
    tn, c = x.shape

    # ---- reductions on the native-dtype tile (no `shifted` materialized) ----
    row_max = jnp.max(x, axis=-1, keepdims=True).astype(jnp.float32)    # (TN,1)
    sum_x = jnp.sum(x, axis=-1, keepdims=True, dtype=jnp.float32)       # (TN,1)
    class_ids = jax.lax.broadcasted_iota(jnp.int32, (tn, c), 1)
    lab_x = jnp.sum(jnp.where(class_ids == labels, x, 0),
                    axis=-1, keepdims=True, dtype=jnp.float32)          # (TN,1)

    # ---- the only full-tile f32 path: exp(x - max) fused into the lse sum ---
    # TODO(synk): if a v7x bundle dump shows the XLU as the binding slot,
    # offload this row-sum (and sum_x) to the MXU via jnp.dot(x_f32, ones(C,1)).
    lse = jnp.log(jnp.sum(jnp.exp(x.astype(jnp.float32) - row_max),
                          axis=-1, keepdims=True))                      # (TN,1)

    # Recover shifted-logit statistics algebraically (all (TN, 1) f32).
    sum_shift = lax_sub = sum_x - jnp.float32(c) * row_max
    lab_shift = lab_x - row_max

    one_m_eps = jnp.float32(1.0 - epsilon)
    inv_nc = jnp.float32(epsilon / num_classes)
    lse_coef = jnp.float32((1.0 - epsilon) + epsilon * c / num_classes)
    loss_row = lse_coef * lse - one_m_eps * lab_shift - inv_nc * sum_shift

    # Single validity mask: where() (not multiply) so NaN/inf garbage from
    # padded tail rows can never leak into the reduction.
    row_ids = (pl.program_id(0) * block_rows
               + jax.lax.broadcasted_iota(jnp.int32, (tn, 1), 0))
    partial = jnp.sum(jnp.where(row_ids < n_rows, loss_row, jnp.float32(0.0)))

    # Lane-dense (1, 128) slab; each grid block owns a disjoint column range.
    partial_ref[...] = jnp.broadcast_to(partial, partial_ref.shape)


def _round_up(v, m):
    return (v + m - 1) // m * m


def cross_entropy_label_smooth(logits, labels, *, epsilon=0.1,
                               num_classes=None, block_rows=None):
    """logits: (N, C) float (f32/bf16); labels: (N,) int. Returns scalar f32."""
    n, c = logits.shape
    if num_classes is None:
        num_classes = c
    labels_2d = labels.astype(jnp.int32).reshape(n, 1)

    itemsize = jnp.dtype(logits.dtype).itemsize
    # Sublane packing granularity in rows: f32 -> 8, bf16/f16 -> 16, 8-bit -> 32.
    packing = {4: 8, 2: 16, 1: 32}.get(itemsize, 8)

    # Generation-aware VMEM budget.
    try:
        vmem_cap = int(pltpu.get_tpu_info().vmem_capacity_bytes)
    except Exception:  # pragma: no cover - conservative fallback off-TPU
        vmem_cap = 64 * 1024 * 1024
    if vmem_cap <= 64 * 1024 * 1024:            # v7x-class: 64 MiB / TensorCore
        usable_bytes = 40 * 1024 * 1024
        vmem_limit_cap = 56 * 1024 * 1024
    else:                                        # v5e / v6e: 128 MiB
        usable_bytes = 80 * 1024 * 1024
        vmem_limit_cap = 96 * 1024 * 1024

    # Per-row VMEM: double-buffered native input tile + ~3 f32 row-length temps
    # (upcast / exp chain headroom inside the kernel).
    per_row_bytes = 2 * c * itemsize + 3 * c * 4

    if block_rows is None:
        block_rows = usable_bytes // max(1, per_row_bytes)
        block_rows = max(packing, min(4096, (block_rows // packing) * packing))
        # Megacore: keep >= 2 blocks on the "parallel" row axis when possible,
        # so both v7x TensorCores get work even for modest batches.
        if n > packing and pl.cdiv(n, block_rows) < 2:
            block_rows = max(packing, _round_up((n + 1) // 2, packing))
    block_rows = int(max(packing, min(_round_up(int(block_rows), packing),
                                      _round_up(n, packing))))

    grid = (pl.cdiv(n, block_rows),)
    num_blocks = grid[0]

    tile_bytes = block_rows * c * itemsize
    f32_tile_bytes = block_rows * c * 4
    budget = 2 * tile_bytes + 3 * f32_tile_bytes + (2 << 20)
    vmem_limit = int(min(vmem_limit_cap, max(32 * 1024 * 1024, budget)))

    kernel = functools.partial(
        _ce_label_smooth_kernel,
        epsilon=float(epsilon),
        num_classes=int(num_classes),
        n_rows=int(n),
        block_rows=block_rows,
    )

    # TODO(synk): if profiling shows exposed DMA at tile boundaries on v7x,
    # add pipeline_mode=pl.Buffered(3) to the logits BlockSpec.
    partials = pl.pallas_call(
        kernel,
        out_shape=jax.ShapeDtypeStruct((1, num_blocks * _LANES), jnp.float32),
        grid=grid,
        in_specs=[
            pl.BlockSpec((block_rows, c), lambda i: (i, 0)),   # logits tile
            pl.BlockSpec((block_rows, 1), lambda i: (i, 0)),   # labels tile
        ],
        out_specs=pl.BlockSpec((1, _LANES), lambda i: (0, i)),
        compiler_params=pltpu.CompilerParams(
            dimension_semantics=("parallel",),
            vmem_limit_bytes=vmem_limit,
        ),
    )(logits, labels_2d)

    # Final combine: lane 0 of each block's slab, one tiny sum, one exact /N.
    return jnp.sum(partials.reshape(num_blocks, _LANES)[:, 0]) / jnp.float32(n)


def _reference(logits, labels, epsilon, num_classes):
    log_probs = jax.nn.log_softmax(logits.astype(jnp.float32), axis=1)
    one_hot = jax.nn.one_hot(labels, logits.shape[1], dtype=jnp.float32)
    targets = (1.0 - epsilon) * one_hot + epsilon / num_classes
    return (-targets * log_probs).mean(0).sum()


if __name__ == "__main__":
    key = jax.random.PRNGKey(0)
    k1, k2, k3, k4, k5, k6 = jax.random.split(key, 6)

    # Test 1: f32 logits, auto tiling -> megacore split into 2 row blocks.
    N1, C1 = 32, 128
    logits1 = jax.random.normal(k1, (N1, C1), dtype=jnp.float32)
    labels1 = jax.random.randint(k2, (N1,), 0, C1, dtype=jnp.int32)
    loss1 = jax.block_until_ready(
        cross_entropy_label_smooth(logits1, labels1, epsilon=0.1, num_classes=C1))
    ref1 = _reference(logits1, labels1, 0.1, C1)
    assert jnp.allclose(loss1, ref1, atol=1e-5, rtol=1e-5), (loss1, ref1)

    # Test 2: bf16 logits streamed natively (16-row packing), ragged batch
    # (N not a multiple of the row tile) exercising the tail mask.
    N2, C2 = 13, 384
    logits2 = jax.random.normal(k3, (N2, C2), dtype=jnp.float32).astype(jnp.bfloat16)
    labels2 = jax.random.randint(k4, (N2,), 0, C2, dtype=jnp.int32)
    loss2 = jax.block_until_ready(
        cross_entropy_label_smooth(logits2, labels2, epsilon=0.1, num_classes=C2))
    ref2 = _reference(logits2, labels2, 0.1, C2)
    assert jnp.allclose(loss2, ref2, atol=1e-4, rtol=1e-4), (loss2, ref2)

    # Test 3: explicit small row tile -> 3 grid blocks with a masked tail row.
    N3, C3 = 23, 128
    logits3 = jax.random.normal(k5, (N3, C3), dtype=jnp.float32)
    labels3 = jax.random.randint(k6, (N3,), 0, C3, dtype=jnp.int32)
    loss3 = jax.block_until_ready(
        cross_entropy_label_smooth(logits3, labels3, epsilon=0.1,
                                   num_classes=C3, block_rows=8))
    ref3 = _reference(logits3, labels3, 0.1, C3)
    assert jnp.allclose(loss3, ref3, atol=1e-5, rtol=1e-5), (loss3, ref3)

    # TODO(synk): for vocab-scale C (>~16K), add an inner "arbitrary" grid axis
    # over classes with an online (flash-style) logsumexp to keep row tiles wide.

    print("KERNEL_OK")
</pallas_src>

<mosaic_0001>
module attributes {stable_mosaic.version = 11 : i64} {
  func.func @_ce_label_smooth_kernel(%arg0: i32, %arg1: memref<16x128xf32, #tpu.memory_space<vmem>>, %arg2: memref<16x1xi32, #tpu.memory_space<vmem>>, %arg3: memref<1x128xf32, #tpu.memory_space<vmem>>) attributes {dimension_semantics = [#tpu.dimension_semantics<parallel>], iteration_bounds = array<i64: 2>, scalar_prefetch = 0 : i64, scratch_operands = 0 : i64, tpu.core_type = #tpu.core_type<tc>, window_params = [{transform_indices = @transform_0, window_bounds = array<i64: 16, 128>}, {transform_indices = @transform_1, window_bounds = array<i64: 16, 1>}, {transform_indices = @transform_2, window_bounds = array<i64: 1, 128>}]} {
    %c0 = arith.constant 0 : index
    %c0_0 = arith.constant 0 : index
    %0 = vector.load %arg1[%c0, %c0_0] : memref<16x128xf32, #tpu.memory_space<vmem>>, vector<16x128xf32>
    %c0_1 = arith.constant 0 : index
    %c0_2 = arith.constant 0 : index
    %1 = vector.load %arg2[%c0_1, %c0_2] : memref<16x1xi32, #tpu.memory_space<vmem>>, vector<16x1xi32>
    %cst = arith.constant dense<0xFF800000> : vector<16xf32>
    %2 = vector.multi_reduction <maximumf>, %0, %cst [1] : vector<16x128xf32> to vector<16xf32>
    %3 = vector.shape_cast %2 : vector<16xf32> to vector<16x1xf32>
    %cst_3 = arith.constant dense<0.000000e+00> : vector<16xf32>
    %4 = vector.multi_reduction <add>, %0, %cst_3 [1] : vector<16x128xf32> to vector<16xf32>
    %5 = vector.shape_cast %4 : vector<16xf32> to vector<16x1xf32>
    %6 = tpu.iota {dimensions = array<i32: 1>} : vector<16x128xi32>
    %7 = vector.broadcast %1 : vector<16x1xi32> to vector<16x128xi32>
    %8 = arith.cmpi eq, %6, %7 : vector<16x128xi32>
    %c0_i32 = arith.constant 0 : i32
    %9 = arith.sitofp %c0_i32 : i32 to f32
    %10 = vector.broadcast %9 : f32 to vector<16x128xf32>
    %11 = arith.select %8, %0, %10 : vector<16x128xi1>, vector<16x128xf32>
    %cst_4 = arith.constant dense<0.000000e+00> : vector<16xf32>
    %12 = vector.multi_reduction <add>, %11, %cst_4 [1] : vector<16x128xf32> to vector<16xf32>
    %13 = vector.shape_cast %12 : vector<16xf32> to vector<16x1xf32>
    %14 = vector.broadcast %3 : vector<16x1xf32> to vector<16x128xf32>
    %15 = arith.subf %0, %14 : vector<16x128xf32>
    %16 = math.exp %15 : vector<16x128xf32>
    %cst_5 = arith.constant dense<0.000000e+00> : vector<16xf32>
    %17 = vector.multi_reduction <add>, %16, %cst_5 [1] : vector<16x128xf32> to vector<16xf32>
    %18 = vector.shape_cast %17 : vector<16xf32> to vector<16x1xf32>
    %19 = math.log %18 : vector<16x1xf32>
    %cst_6 = arith.constant 1.280000e+02 : f32
    %20 = vector.broadcast %cst_6 : f32 to vector<16x1xf32>
    %21 = arith.mulf %20, %3 : vector<16x1xf32>
    %22 = arith.subf %5, %21 : vector<16x1xf32>
    %23 = arith.subf %13, %3 : vector<16x1xf32>
    %cst_7 = arith.constant 1.000000e+00 : f32
    %24 = vector.broadcast %cst_7 : f32 to vector<16x1xf32>
    %25 = arith.mulf %24, %19 : vector<16x1xf32>
    %cst_8 = arith.constant 0.899999976 : f32
    %26 = vector.broadcast %cst_8 : f32 to vector<16x1xf32>
    %27 = arith.mulf %26, %23 : vector<16x1xf32>
    %28 = arith.subf %25, %27 : vector<16x1xf32>
    %cst_9 = arith.constant 7.812500e-04 : f32
    %29 = vector.broadcast %cst_9 : f32 to vector<16x1xf32>
    %30 = arith.mulf %29, %22 : vector<16x1xf32>
    %31 = arith.subf %28, %30 : vector<16x1xf32>
    %c16_i32 = arith.constant 16 : i32
    %32 = arith.muli %arg0, %c16_i32 : i32
    %33 = tpu.iota {dimensions = array<i32: 0>} : vector<16x1xi32>
    %34 = vector.broadcast %32 : i32 to vector<16x1xi32>
    %35 = arith.addi %34, %33 : vector<16x1xi32>
    %c32_i32 = arith.constant 32 : i32
    %36 = vector.broadcast %c32_i32 : i32 to vector<16x1xi32>
    %37 = arith.cmpi slt, %35, %36 : vector<16x1xi32>
    %cst_10 = arith.constant 0.000000e+00 : f32
    %38 = vector.broadcast %cst_10 : f32 to vector<16x1xf32>
    %39 = arith.select %37, %31, %38 : vector<16x1xi1>, vector<16x1xf32>
    %40 = vector.shape_cast %39 : vector<16x1xf32> to vector<1x16x1xf32>
    %cst_11 = arith.constant dense<0.000000e+00> : vector<1xf32>
    %41 = vector.multi_reduction <add>, %40, %cst_11 [1, 2] : vector<1x16x1xf32> to vector<1xf32>
    %42 = vector.shape_cast %41 : vector<1xf32> to vector<1x1x1xf32>
    %43 = vector.extract %42[0, 0, 0] : f32 from vector<1x1x1xf32>
    %44 = vector.broadcast %43 : f32 to vector<1x128xf32>
    %c0_12 = arith.constant 0 : index
    %c0_13 = arith.constant 0 : index
    %45 = vector.load %arg3[%c0_12, %c0_13] : memref<1x128xf32, #tpu.memory_space<vmem>>, vector<1x128xf32>
    tpu.vector_store %arg3[%c0_12, %c0_13], %44 {strides = array<i32>} : memref<1x128xf32, #tpu.memory_space<vmem>>, vector<1x128xf32>,
    return
  }
  func.func @transform_0(%arg0: i32) -> (i32, i32) {
    %c0_i32 = arith.constant 0 : i32
    %c0_i32_0 = arith.constant 0 : i32
    return %arg0, %c0_i32 : i32, i32
  }
  func.func @transform_1(%arg0: i32) -> (i32, i32) {
    %c0_i32 = arith.constant 0 : i32
    %c0_i32_0 = arith.constant 0 : i32
    return %arg0, %c0_i32 : i32, i32
  }
  func.func @transform_2(%arg0: i32) -> (i32, i32) {
    %c0_i32 = arith.constant 0 : i32
    %c0_i32_0 = arith.constant 0 : i32
    return %c0_i32, %arg0 : i32, i32
  }
}

</mosaic_0001>

<bundles_post_ra>
// kernel: tpu_custom_call.1
= control target key start
LH: loop header
LB: loop body
LE: loop exit
PB: predicated region body
PF: predicated region fallthrough
CT: control target
= control target key end

     0   :  { %7 = vsyncpa [#allocation3], 0  ;;  %s558_s0 = inlined_call_operand.vmem [shape: f32[32,128], index: 0, kind: input, shape index: {}]   ;;  %s559_s1 = inlined_call_operand.vmem [shape: s32[32,1], index: 1, kind: input, shape index: {}]   ;;  %s560_s2 = inlined_call_operand.hbm [shape: f32[1,256], index: 2, kind: output, shape index: {}]  }
   0x1   :  { %9 = vsyncpa [#allocation3 + $0x1], 0  ;;  %s470_s9 = smov 0   ;;  %s472_s10 = smov 0  }
   0x2   :  { %s474_s11 = smov 0   ;;  %s476_s12 = smov 0  }
   0x3 LB: > { %s491_s13 = sadd.s32 4294967295, %s452_s12   ;;  %s327_s14 = sadd.s32 4294967294, %s452_s12   ;;  %s452_s12 = sphi %s476_s12, %s566_s12   ;;  %s448_s11 = sphi %s474_s11, %s565_s11   ;;  %s444_s10 = sphi %s472_s10, %s564_s10   ;;  %s440_s9 = sphi %s470_s9, %s563_s9  }
   0x4   : > { %s495_s15 = sadd.s32 1, %s452_s12   ;;  %s74_s16 = sadd.s32 1, %s448_s11 }
   0x5   : > { %s71_s17 = ssub.s32 %s452_s12, %s495_s15  ;;  %p84_p0 = scmp.ne.s32.totalorder %s448_s11, %s444_s10 }
   0x6   : > { %p72_p1 = scmp.eq.s32.totalorder %s71_s17, 0  ;;  %p85_p2 = scmp.eq.s32.totalorder %s491_s13, 1 }
   0x7   : > { %p90_p3 = scmp.ne.s32.totalorder %s444_s10, %s440_s9  ;;  %p91_p4 = scmp.eq.s32.totalorder %s327_s14, 1 }
   0x8   : > { %s506_s18 = scalar_select %p72_p1, %s448_s11, %s74_s16  }
   0x9   : > { %p508_p5 = por %p85_p2, %p84_p0  ;;  %p512_p6 = por %p91_p4, %p90_p3 }
   0xa   : > { %p330_p7 = scmp.ge.s32.totalorder %s452_s12, 1  ;;  %p127_p8 = scmp.lt.s32.totalorder %s452_s12, 3 }
   0xc   : > { %p128_p9 = pnand %p330_p7, %p127_p8 }
   0xd   : > { %s331_s21 = sshll.u32 (!%p128_p9), %s491_s13, 1  ;;  %s335_s29 = sshll.u32 (!%p128_p9), %s491_s13, 4 }
   0xe   : > { %131 = sbr.rel (%p128_p9) target bundleno = 475 (0x1db), region = 28  ;;  %p154_p10 = scmp.lt.s32.totalorder (!%p128_p9), %s331_s21, 3 }
   0xf   : > { %s151_s30 = sand.u32 (!%p128_p9), 1, %s444_s10   ;;  %s256_s5 = scalar_lea.hbm (!%p128_p9), %s560_s2, %s491_s13 }
  0x10   : > { %s152_s6 = scalar_lea.vmem (!%p128_p9), [#allocation2], %s151_s30  ;;  %s260_s8 = sshll.u32 (!%p128_p9), %s256_s5, 4  ;;  %s261_s8 = int_to_ptr.hbm [resolvable:$true] %s260_s8 }
  0x11   : > { %s258_s7 = sshll.u32 (!%p128_p9), %s152_s6, 4  ;;  %s248_s16 = scalar_lea.sflag (!%p128_p9), [#allocation3], %s151_s30  ;;  %s259_s7 = int_to_ptr.vmem [resolvable:$true] %s258_s7 }
  0x12   : > { %s404_s17 = sshra.s32 (!%p128_p9), %s261_s8, 4  ;;  %s410_s13 = scalar_lea.hbm (!%p128_p9), %s560_s2, 2  ;;  %s405_s17 = int_to_ptr.hbm [resolvable:$true] %s404_s17 }
  0x13   : > { %v454_v0 = vmov 0   ;;  %s568_s21 = smov (!%p154_p10, %s331_s21), 3  ;;  %v177_v5 = vlaneseq  ;;  %v225_v29 = vstv %s335_s29  ;;  %vm232_vm4 = vcmask 7168   ;;  %p411_p0 = scmp.lt.s32.totalorder %s405_s17, %s560_s2 }
  0x14   : > { %380 = vset.pattern.permute.xlu1 %v454_v0  ;;  %381 = vset.pattern.permute.xlu0 %v454_v0  ;;  %s332_s22 = sshll.u32 %s568_s21, 3  ;;  %s406_s21 = scalar_lea.hbm %s405_s17, 1 }
  0x15   : > { %s163_s25 = scalar_lea.vmem %s559_s1, %s332_s22  ;;  %s157_s28 = scalar_lea.vmem %s558_s0, %s332_s22  ;;  %v178_v6 = vand.u32 127, %v177_v5  ;;  %v223_v21 = vshrl.u32 %v177_v5, 7 }
  0x16   : > { %v167_v1 = vld [vmem:[%s163_s25] sm:$0xff]  ;;  %v168_v3 = vld [vmem:[%s163_s25 + $0x8] sm:$0xff]  ;;  %p407_p11 = scmp.ne.s32.totalorder %s405_s17, %s406_s21  ;;  %p412_p1 = scmp.lt.s32.totalorder %s410_s13, %s406_s21 }
  0x17   : > { %v165_v2 = vld [vmem:[%s157_s28] sm:$0xff]  ;;  %180 = vperm.xlu1 %380, %v167_v1   ;;  %v166_v4 = vld [vmem:[%s157_s28 + $0x8] sm:$0xff]  ;;  %v224_v25 = vadd.s32 8, %v223_v21  ;;  %v226_v39 = vadd.s32 %v225_v29, %v223_v21 }
  0x18   : > { %169 = vmax.xlane.f32.xlu0 %v165_v2  ;;  %p408_p12 = pnand %p407_p11, %p508_p5  ;;  %p413_p2 = por %p412_p1, %p411_p0 }
  0x19   : > { %v227_v35 = vadd.s32 %v225_v29, %v224_v25  ;;  %vm228_vm3 = vcmp.lt.s32.totalorder %v226_v39, 32 }
  0x1a   : > { %p409_p13 = pneg %p408_p12 }
  0x1b   : > { %vm229_vm2 = vcmp.lt.s32.totalorder %v227_v35, 32 }
  0x1c   : > { %p414_p3 = pnand %p413_p2, %p409_p13 }
  0x1f   : > { %183 = vperm.xlu1 %380, %v168_v3  }
  0x20   : > { %171 = vmax.xlane.f32.xlu0 %v166_v4 }
  0x89   : > { %v181_v7 = vpop.permute.xlu1 %180 }
  0x8a   : > { %vm185_vm0 = vcmp.eq.s32.totalorder %v178_v6, %v181_v7 }
  0x8b   : > { %v170_v8 = vpop.xlane.xlu0 %169  ;;  %v187_v9 = vsel %vm185_vm0, %v165_v2, 0.0 }
  0x8c   : > { %v193_v10 = vsub.f32 %v165_v2, %v170_v8  ;;  %189 = vadd.xlane.f32.xlu0 %v187_v9  ;;  %v207_v34 = vmul.f32 128.0, %v170_v8 }
  0x8e   : > { %v195_v11 = vmul.f32 1.442695, %v193_v10 }
  0x90   : > { %382 = vpow2.f32 %v195_v11 }
  0x91   : > { %v184_v12 = vpop.permute.xlu1 %183 }
  0x92   : > { %vm186_vm1 = vcmp.eq.s32.totalorder %v178_v6, %v184_v12 }
  0x93   : > { %v172_v13 = vpop.xlane.xlu0 %171  ;;  %v188_v15 = vsel %vm186_vm1, %v166_v4, 0.0 }
  0x94   : > { %v194_v14 = vsub.f32 %v166_v4, %v172_v13  ;;  %191 = vadd.xlane.f32.xlu1 %v188_v15  ;;  %175 = vadd.xlane.f32.xlu0 %v166_v4  ;;  %v208_v28 = vmul.f32 128.0, %v172_v13 }
  0x96   : > { %v383_v16 = vpop.eup %382  ;;  %v197_v17 = vmul.f32 1.442695, %v194_v14 }
  0x97   : > { %199 = vadd.xlane.f32.xlu2 %v383_v16 }
  0x98   : > { %384 = vpow2.f32 %v197_v17 }
  0x9e   : > { %v385_v18 = vpop.eup %384 }
  0x9f   : > { %201 = vadd.xlane.f32.xlu2 %v385_v18 }
  0xa7   : > { %173 = vadd.xlane.f32.xlu2 %v165_v2 }
  0xff   : > { %v190_v20 = vpop.xlane.xlu0 %189 }
 0x100   : > { %v211_v30 = vsub.f32 %v190_v20, %v170_v8 }
 0x102   : > { %v213_v40 = vmul.f32 0.9, %v211_v30 }
 0x107   : > { %v192_v23 = vpop.xlane.xlu1 %191  ;;  %v176_v24 = vpop.xlane.xlu0 %175 }
 0x108   : > { %v212_v27 = vsub.f32 %v192_v23, %v172_v13  ;;  %v210_v31 = vsub.f32 %v176_v24, %v208_v28 }
 0x10a   : > { %v200_v19 = vpop.xlane.xlu2 %199  ;;  %v214_v36 = vmul.f32 0.9, %v212_v27  ;;  %v218_v42 = vmul.f32 0.00078125, %v210_v31 }
 0x10b   : > { %386 = vlog2.f32 %v200_v19 }
 0x111   : > { %v387_v26 = vpop.eup %386 }
 0x112   : > { %v202_v22 = vpop.xlane.xlu2 %201  ;;  %v204_v33 = vmul.f32 0.6931472, %v387_v26 }
 0x113   : > { %388 = vlog2.f32 %v202_v22 }
 0x114   : > { %v215_v44 = vsub.f32 %v204_v33, %v213_v40 }
 0x119   : > { %v389_v32 = vpop.eup %388 }
 0x11a   : > { %v206_v37 = vmul.f32 0.6931472, %v389_v32  ;;  %v174_v38 = vpop.xlane.xlu2 %173 }
 0x11b   : > { %v209_v41 = vsub.f32 %v174_v38, %v207_v34 }
 0x11c   : > { %v216_v43 = vsub.f32 %v206_v37, %v214_v36 }
 0x11d   : > { %v217_v45 = vmul.f32 0.00078125, %v209_v41 }
 0x11e   : > { %v220_v46 = vsub.f32 %v216_v43, %v218_v42 }
 0x11f   : > { %v219_v47 = vsub.f32 %v215_v44, %v217_v45 }
 0x120   : > { %v231_v48 = vsel %vm229_vm2, %v220_v46, 0.0 }
 0x121   : > { %v230_v49 = vsel %vm228_vm3, %v219_v47, 0.0  ;;  %v234_v50 = vsel %vm232_vm4, %v231_v48, 0.0 }
 0x122   : > { %v233_v51 = vsel %vm232_vm4, %v230_v49, 0.0 }
 0x123   : > { %v235_v52 = vadd.f32 %v234_v50, %v233_v51 }
 0x125   : > { %236 = vadd.xlane.f32.xlu2 %v235_v52 }
 0x198   : > { %v237_v53 = vpop.xlane.xlu2 %236 }
 0x199   : > { %v238_v54 = vrot.slane %v237_v53, 4 }
 0x19b   : > { %v239_v55 = vadd.f32 %v238_v54, %v237_v53 }
 0x19d   : > { %v240_v56 = vrot.slane %v239_v55, 2 }
 0x19f   : > { %v241_v57 = vadd.f32 %v240_v56, %v239_v55 }
 0x1a1   : > { %v242_v58 = vrot.slane %v241_v57, 1 }
 0x1a3   : > { %v243_v59 = vadd.f32 %v242_v58, %v241_v57 }
 0x1a5   : > { %338 = vpush %v243_v59 }
 0x1d6   : > { %s339_s14 = spop %338 }
 0x1d7   : > { %v245_v60 = vstv %s339_s14 }
 0x1d8   : > { %246 = vst [vmem:[%s152_s6] sm:$0x1] %v245_v60 }
 0x1d9   : > { %417 = shalt.err (!%p414_p3)
}
 0x1da   : > { %340 = dma.vmem_to_hbm [thread:$0]  (%p508_p5), %s259_s7, 16, %s261_s8, %s248_s16  }
 0x1db PF: > { %p346_p4 = scmp.ge.s32.totalorder %s452_s12, 2  ;;  %s272_s26 = sand.u32 1, %s440_s9  }
 0x1dc   : > { %s273_s27 = scalar_lea.sflag [#allocation3], %s272_s26 }
 0x1dd   : > { %p343_p7 = pnand %p346_p4, %p512_p6 }
 0x1df   : > { %p344_p8 = pneg %p343_p7 }
 0x1e1   : > { %435 = dma.done.wait (%p344_p8), %s273_s27, 16  }
 0x1e2   : > { %437 = vsyncadd (%p344_p8), %s273_s27, 4294967280  ;;  %p12_p9 = scmp.ge.s32.totalorder %s495_s15, 4   ;;  %s563_s9 = smov %s444_s10 }
 0x1e3   : > { %s564_s10 = smov %s448_s11  ;;  %s565_s11 = smov %s506_s18 }
 0x1e4   : > { %s566_s12 = smov %s495_s15  ;;  %14 = sbr.rel (!%p12_p9) target bundleno = 3 (0x3), region = 66 }
 0x1e9   :  { %278 = vsyncpa [#allocation3], 1 }
 0x1ea   :  { %280 = vsyncpa [#allocation3 + $0x1], 1 }

</bundles_post_ra>
